<compile_context>
chip_gen: v5e
topology: v5e:2x2
jax: 0.10.0
libtpu: 0.0.40
codegen_flags: <defaults>
</compile_context>

<pallas_src>
import functools

import jax
import jax.numpy as jnp
from jax.experimental import pallas as pl
from jax.experimental.pallas import tpu as pltpu


def _conv_bn_relu_kernel(w_ref, gamma_ref, beta_ref, p_ref, o_ref,
                         sum_ref, sq_ref, scale_ref, shift_ref, *rest,
                         m_valid, eps, n_hw_tiles, resident):
    # w_ref:     (Cout, Kp)        bf16, resident conv weight
    # gamma_ref: (Cout, 1)         f32, resident BN weight
    # beta_ref:  (Cout, 1)         f32, resident BN bias
    # p_ref:     (1, Kp, hw_tile)  bf16, streamed im2col patch tile
    # o_ref:     (1, Cout, hw_tile) lane-dense output tile
    # sum/sq/scale/shift: (Cout, 1) f32 scratch (persist across the grid)
    # rest[0] (optional): (N*n_hw_tiles, Cout, hw_tile) f32 resident conv
    phase = pl.program_id(0)
    n = pl.program_id(1)
    j = pl.program_id(2)
    idx = n * n_hw_tiles + j

    @pl.when((phase == 0) & (n == 0) & (j == 0))
    def _init():
        sum_ref[...] = jnp.zeros_like(sum_ref)
        sq_ref[...] = jnp.zeros_like(sq_ref)

    @pl.when(phase == 0)
    def _stats():
        # Zero-padded K rows / HW columns contribute exactly zero (no bias).
        conv = jnp.dot(w_ref[...], p_ref[0],
                       preferred_element_type=jnp.float32)   # (Cout, hw_tile)
        if resident:
            rest[0][idx] = conv
        sum_ref[...] += jnp.sum(conv, axis=1, keepdims=True)
        sq_ref[...] += jnp.sum(conv * conv, axis=1, keepdims=True)

    @pl.when((phase == 1) & (n == 0) & (j == 0))
    def _finalize_stats():
        inv_m = 1.0 / m_valid
        mean = sum_ref[...] * inv_m                           # (Cout, 1)
        var = sq_ref[...] * inv_m - mean * mean               # biased batch var
        scale = gamma_ref[...] * jax.lax.rsqrt(var + eps)
        scale_ref[...] = scale
        shift_ref[...] = beta_ref[...] - mean * scale

    @pl.when(phase == 1)
    def _apply():
        if resident:
            conv = rest[0][idx]                               # no 2nd matmul/DMA
        else:
            conv = jnp.dot(w_ref[...], p_ref[0],
                           preferred_element_type=jnp.float32)
        y = conv * scale_ref[...] + shift_ref[...]            # lane broadcast
        o_ref[0] = jnp.maximum(y, 0.0).astype(o_ref.dtype)


def initial_block_str(x_nchw, conv_w, bn_gamma, bn_beta, *,
                      eps=1e-5,
                      hw_tile_target=16384,
                      out_dtype=jnp.float32,          # bf16 is a good v5e option
                      max_resident_bytes=20 * 1024 * 1024):
    """Forward pass of InitialBlockSTR.  x_nchw: (N, Cin, H, W) float32."""
    N, Cin, H, W = x_nchw.shape
    Cout, Cin_w, KH, KW = conv_w.shape
    assert Cin_w == Cin and (KH, KW) == (3, 3)
    stride = 2
    Ho = (H + 2 - KH) // stride + 1
    Wo = (W + 2 - KW) // stride + 1
    HW = Ho * Wo
    K = Cin * KH * KW
    LANE, SUB = 128, 32
    out_isize = jnp.dtype(out_dtype).itemsize

    # ---- glue: bf16 im2col straight into per-sample (N, K, HW) layout whose
    # K ordering (cin-major, then kh, kw) matches conv_w.reshape(Cout, K).
    xb = jnp.pad(x_nchw.astype(jnp.bfloat16), ((0, 0), (0, 0), (1, 1), (1, 1)))
    views = [xb[:, :, kh:kh + stride * Ho:stride, kw:kw + stride * Wo:stride]
             for kh in range(KH) for kw in range(KW)]       # each (N,Cin,Ho,Wo)
    patches = jnp.stack(views, axis=2).reshape(N, K, HW)    # (N, Cin*9, Ho*Wo)

    # ---- tiling: K -> multiple of 32 sublanes; HW -> hw_tile lanes.
    Kp = ((K + SUB - 1) // SUB) * SUB
    hw_tile = max(LANE, (int(hw_tile_target) // LANE) * LANE)
    hw_tile = min(hw_tile, ((HW + LANE - 1) // LANE) * LANE)

    def pipe_bytes(t):   # double-buffered streaming working set
        return 2 * (Kp * t * 2) + 2 * (Cout * t * out_isize)

    while hw_tile > LANE and pipe_bytes(hw_tile) > 12 * 1024 * 1024:
        hw_tile = max(LANE, ((hw_tile // 2) // LANE) * LANE)
    n_hw = pl.cdiv(HW, hw_tile)
    HWp = n_hw * hw_tile

    patches = jnp.pad(patches, ((0, 0), (0, Kp - K), (0, HWp - HW)))
    w2d = jnp.pad(conv_w.reshape(Cout, K).astype(jnp.bfloat16),
                  ((0, 0), (0, Kp - K)))
    gamma2d = bn_gamma.reshape(Cout, 1).astype(jnp.float32)
    beta2d = bn_beta.reshape(Cout, 1).astype(jnp.float32)

    # ---- size-gated fast path: keep the whole conv resident in VMEM so
    # phase 1 is pure VPU (no second patch DMA, no second MXU pass).
    resident_bytes = N * n_hw * Cout * hw_tile * 4
    budget = 44 * 1024 * 1024          # safe under v7x's 64 MiB physical VMEM
    resident = (resident_bytes <= max_resident_bytes and
                resident_bytes + pipe_bytes(hw_tile) + (4 << 20) <= budget)
    vmem_limit = int(min(budget, max(32 << 20,
                                     (resident_bytes if resident else 0)
                                     + pipe_bytes(hw_tile) + (4 << 20))))

    if resident:
        # Phase 1 never reads patches -> park its block index (one stale DMA
        # at the phase boundary, then no re-streaming).
        patch_map = lambda p, n, j: (n * (1 - p), 0, j * (1 - p))
    else:
        patch_map = lambda p, n, j: (n, 0, j)

    scratch = [pltpu.VMEM((Cout, 1), jnp.float32),   # sum
               pltpu.VMEM((Cout, 1), jnp.float32),   # sum of squares
               pltpu.VMEM((Cout, 1), jnp.float32),   # BN scale (phase 1)
               pltpu.VMEM((Cout, 1), jnp.float32)]   # BN shift (phase 1)
    if resident:
        scratch.append(pltpu.VMEM((N * n_hw, Cout, hw_tile), jnp.float32))

    kernel = functools.partial(_conv_bn_relu_kernel,
                               m_valid=float(N * HW), eps=float(eps),
                               n_hw_tiles=n_hw, resident=resident)

    passes = 1 if resident else 2
    cost = pl.CostEstimate(
        flops=int(2 * Cout * Kp * N * HWp * passes),
        transcendentals=int(Cout),
        bytes_accessed=int(patches.size * 2 * passes + w2d.size * 2
                           + 2 * Cout * 4 + N * Cout * HWp * out_isize))

    out = pl.pallas_call(
        kernel,
        out_shape=jax.ShapeDtypeStruct((N, Cout, HWp), out_dtype),
        grid_spec=pltpu.PrefetchScalarGridSpec(
            num_scalar_prefetch=0,
            grid=(2, N, n_hw),           # (phase: stats then normalize, N, HW tiles)
            in_specs=[
                pl.BlockSpec((Cout, Kp), lambda p, n, j: (0, 0)),     # weight
                pl.BlockSpec((Cout, 1), lambda p, n, j: (0, 0)),      # gamma
                pl.BlockSpec((Cout, 1), lambda p, n, j: (0, 0)),      # beta
                pl.BlockSpec((1, Kp, hw_tile), patch_map),            # patches
            ],
            # Phase 0 never writes the output: park its block at (0,0,0); the
            # first phase-1 step maps to the same block and overwrites it
            # before any index change triggers a write-back, so no garbage
            # ever reaches HBM.
            out_specs=pl.BlockSpec((1, Cout, hw_tile),
                                   lambda p, n, j: (n * p, 0, j * p)),
            scratch_shapes=scratch,
        ),
        compiler_params=pltpu.CompilerParams(
            dimension_semantics=("arbitrary", "arbitrary", "arbitrary"),
            vmem_limit_bytes=vmem_limit),
        cost_estimate=cost,
    )(w2d, gamma2d, beta2d, patches)

    if HWp != HW:
        out = out[:, :, :HW]
    return out.reshape(N, Cout, Ho, Wo)                      # (N, Cout, Ho, Wo)


def _reference(x, conv_w, gamma, beta, eps=1e-5):
    # Matches the kernel's bf16 matmul inputs with f32 accumulation.
    dn = jax.lax.conv_dimension_numbers(x.shape, conv_w.shape,
                                        ('NCHW', 'OIHW', 'NCHW'))
    conv = jax.lax.conv_general_dilated(
        x.astype(jnp.bfloat16), conv_w.astype(jnp.bfloat16),
        (2, 2), ((1, 1), (1, 1)), dimension_numbers=dn,
        preferred_element_type=jnp.float32)
    mean = conv.mean(axis=(0, 2, 3), keepdims=True)
    var = conv.var(axis=(0, 2, 3), keepdims=True)   # biased, as in BN training
    y = (conv - mean) * jax.lax.rsqrt(var + eps)
    y = y * gamma.reshape(1, -1, 1, 1) + beta.reshape(1, -1, 1, 1)
    return jnp.maximum(y, 0.0)


if __name__ == "__main__":
    key = jax.random.PRNGKey(0)

    def run_case(N, Cin, H, W, Cout, **kw):
        ks = jax.random.split(jax.random.fold_in(key, H * 131 + W), 4)
        x = jax.random.normal(ks[0], (N, Cin, H, W), dtype=jnp.float32)
        conv_w = 0.1 * jax.random.normal(ks[1], (Cout, Cin, 3, 3),
                                         dtype=jnp.float32)
        gamma = 1.0 + 0.1 * jax.random.normal(ks[2], (Cout,), dtype=jnp.float32)
        beta = 0.1 * jax.random.normal(ks[3], (Cout,), dtype=jnp.float32)

        out = jax.block_until_ready(
            initial_block_str(x, conv_w, gamma, beta, **kw))
        ref = jax.block_until_ready(_reference(x, conv_w, gamma, beta))

        Ho = (H + 2 - 3) // 2 + 1
        Wo = (W + 2 - 3) // 2 + 1
        assert out.shape == (N, Cout, Ho, Wo), (out.shape, (N, Cout, Ho, Wo))
        err = float(jnp.max(jnp.abs(out - ref)))
        assert err < 5e-4, err

    # 1) single HW tile per sample; VMEM-resident single-matmul fast path.
    run_case(2, 3, 16, 16, 16)
    # 2) multiple HW tiles + lane padding, still resident (exercises the
    #    dynamic first-axis indexing of the resident conv scratch).
    run_case(2, 3, 34, 34, 16, hw_tile_target=128)
    # 3) same shape with the recompute (two-matmul) fallback path forced.
    run_case(2, 3, 34, 34, 16, hw_tile_target=128, max_resident_bytes=0)

    print("KERNEL_OK")
</pallas_src>

<mosaic_0001>
module attributes {stable_mosaic.version = 11 : i64} {
  func.func @_conv_bn_relu_kernel(%arg0: i32, %arg1: i32, %arg2: i32, %arg3: memref<16x32xbf16, #tpu.memory_space<vmem>>, %arg4: memref<16x1xf32, #tpu.memory_space<vmem>>, %arg5: memref<16x1xf32, #tpu.memory_space<vmem>>, %arg6: memref<1x32x128xbf16, #tpu.memory_space<vmem>>, %arg7: memref<1x16x128xf32, #tpu.memory_space<vmem>>, %arg8: memref<16x1xf32, #tpu.memory_space<vmem>>, %arg9: memref<16x1xf32, #tpu.memory_space<vmem>>, %arg10: memref<16x1xf32, #tpu.memory_space<vmem>>, %arg11: memref<16x1xf32, #tpu.memory_space<vmem>>, %arg12: memref<2x16x128xf32, #tpu.memory_space<vmem>>) attributes {dimension_semantics = [#tpu.dimension_semantics<arbitrary>, #tpu.dimension_semantics<arbitrary>, #tpu.dimension_semantics<arbitrary>], iteration_bounds = array<i64: 2, 2, 1>, scalar_prefetch = 0 : i64, scratch_operands = 5 : i64, tpu.core_type = #tpu.core_type<tc>, window_params = [{pipeline_mode = #tpu.pipeline_mode<synchronous>, transform_indices = @transform_0, window_bounds = array<i64: 16, 32>}, {pipeline_mode = #tpu.pipeline_mode<synchronous>, transform_indices = @transform_1, window_bounds = array<i64: 16, 1>}, {pipeline_mode = #tpu.pipeline_mode<synchronous>, transform_indices = @transform_2, window_bounds = array<i64: 16, 1>}, {transform_indices = @transform_3, window_bounds = array<i64: 1, 32, 128>}, {transform_indices = @transform_4, window_bounds = array<i64: 1, 16, 128>}]} {
    %c1_i32 = arith.constant 1 : i32
    %0 = arith.muli %arg1, %c1_i32 : i32
    %1 = arith.addi %0, %arg2 : i32
    %c0_i32 = arith.constant 0 : i32
    %2 = arith.cmpi eq, %arg0, %c0_i32 : i32
    %c0_i32_0 = arith.constant 0 : i32
    %3 = arith.cmpi eq, %arg1, %c0_i32_0 : i32
    %4 = arith.andi %2, %3 : i1
    %c0_i32_1 = arith.constant 0 : i32
    %5 = arith.cmpi eq, %arg2, %c0_i32_1 : i32
    %6 = arith.andi %4, %5 : i1
    %7 = arith.extui %6 : i1 to i32
    %c0_i32_2 = arith.constant 0 : i32
    %8 = arith.cmpi ne, %7, %c0_i32_2 : i32
    scf.if %8 {
      %cst = arith.constant 0.000000e+00 : f32
      %22 = vector.broadcast %cst : f32 to vector<16x1xf32>
      %c0 = arith.constant 0 : index
      %c0_11 = arith.constant 0 : index
      %23 = vector.load %arg8[%c0, %c0_11] : memref<16x1xf32, #tpu.memory_space<vmem>>, vector<16x1xf32>
      tpu.vector_store %arg8[%c0, %c0_11], %22 {strides = array<i32>} : memref<16x1xf32, #tpu.memory_space<vmem>>, vector<16x1xf32>,
      %cst_12 = arith.constant 0.000000e+00 : f32
      %24 = vector.broadcast %cst_12 : f32 to vector<16x1xf32>
      %c0_13 = arith.constant 0 : index
      %c0_14 = arith.constant 0 : index
      %25 = vector.load %arg9[%c0_13, %c0_14] : memref<16x1xf32, #tpu.memory_space<vmem>>, vector<16x1xf32>
      tpu.vector_store %arg9[%c0_13, %c0_14], %24 {strides = array<i32>} : memref<16x1xf32, #tpu.memory_space<vmem>>, vector<16x1xf32>,
    } else {
    }
    %c0_i32_3 = arith.constant 0 : i32
    %9 = arith.cmpi eq, %arg0, %c0_i32_3 : i32
    %10 = arith.extui %9 : i1 to i32
    %c0_i32_4 = arith.constant 0 : i32
    %11 = arith.cmpi ne, %10, %c0_i32_4 : i32
    scf.if %11 {
      %c0 = arith.constant 0 : index
      %c0_11 = arith.constant 0 : index
      %22 = vector.load %arg3[%c0, %c0_11] : memref<16x32xbf16, #tpu.memory_space<vmem>>, vector<16x32xbf16>
      %c0_12 = arith.constant 0 : index
      %c0_13 = arith.constant 0 : index
      %c0_14 = arith.constant 0 : index
      %23 = vector.load %arg6[%c0_12, %c0_13, %c0_14] : memref<1x32x128xbf16, #tpu.memory_space<vmem>>, vector<1x32x128xbf16>
      %24 = vector.shape_cast %23 : vector<1x32x128xbf16> to vector<32x128xbf16>
      %cst = arith.constant dense<0.000000e+00> : vector<16x128xf32>
      %25 = tpu.matmul %22, %24, %cst {dimension_numbers = #tpu.dot_dimension_numbers<[1], [0], [0], [1], [0, 0, 1, 1], [], []>} : vector<16x32xbf16>, vector<32x128xbf16>, vector<16x128xf32> -> vector<16x128xf32>
      %26 = arith.index_cast %1 : i32 to index
      %c0_15 = arith.constant 0 : index
      %c0_16 = arith.constant 0 : index
      %27 = vector.load %arg12[%26, %c0_15, %c0_16] : memref<2x16x128xf32, #tpu.memory_space<vmem>>, vector<1x16x128xf32>
      %28 = vector.shape_cast %27 : vector<1x16x128xf32> to vector<16x128xf32>
      %29 = vector.shape_cast %25 : vector<16x128xf32> to vector<1x16x128xf32>
      tpu.vector_store %arg12[%26, %c0_15, %c0_16], %29 {strides = array<i32>} : memref<2x16x128xf32, #tpu.memory_space<vmem>>, vector<1x16x128xf32>,
      %c0_17 = arith.constant 0 : index
      %c0_18 = arith.constant 0 : index
      %30 = vector.load %arg8[%c0_17, %c0_18] : memref<16x1xf32, #tpu.memory_space<vmem>>, vector<16x1xf32>
      %cst_19 = arith.constant dense<0.000000e+00> : vector<16xf32>
      %31 = vector.multi_reduction <add>, %25, %cst_19 [1] : vector<16x128xf32> to vector<16xf32>
      %32 = vector.shape_cast %31 : vector<16xf32> to vector<16x1xf32>
      %33 = arith.addf %30, %32 : vector<16x1xf32>
      %c0_20 = arith.constant 0 : index
      %c0_21 = arith.constant 0 : index
      %34 = vector.load %arg8[%c0_20, %c0_21] : memref<16x1xf32, #tpu.memory_space<vmem>>, vector<16x1xf32>
      tpu.vector_store %arg8[%c0_20, %c0_21], %33 {strides = array<i32>} : memref<16x1xf32, #tpu.memory_space<vmem>>, vector<16x1xf32>,
      %c0_22 = arith.constant 0 : index
      %c0_23 = arith.constant 0 : index
      %35 = vector.load %arg9[%c0_22, %c0_23] : memref<16x1xf32, #tpu.memory_space<vmem>>, vector<16x1xf32>
      %36 = arith.mulf %25, %25 : vector<16x128xf32>
      %cst_24 = arith.constant dense<0.000000e+00> : vector<16xf32>
      %37 = vector.multi_reduction <add>, %36, %cst_24 [1] : vector<16x128xf32> to vector<16xf32>
      %38 = vector.shape_cast %37 : vector<16xf32> to vector<16x1xf32>
      %39 = arith.addf %35, %38 : vector<16x1xf32>
      %c0_25 = arith.constant 0 : index
      %c0_26 = arith.constant 0 : index
      %40 = vector.load %arg9[%c0_25, %c0_26] : memref<16x1xf32, #tpu.memory_space<vmem>>, vector<16x1xf32>
      tpu.vector_store %arg9[%c0_25, %c0_26], %39 {strides = array<i32>} : memref<16x1xf32, #tpu.memory_space<vmem>>, vector<16x1xf32>,
    } else {
    }
    %c1_i32_5 = arith.constant 1 : i32
    %12 = arith.cmpi eq, %arg0, %c1_i32_5 : i32
    %c0_i32_6 = arith.constant 0 : i32
    %13 = arith.cmpi eq, %arg1, %c0_i32_6 : i32
    %14 = arith.andi %12, %13 : i1
    %c0_i32_7 = arith.constant 0 : i32
    %15 = arith.cmpi eq, %arg2, %c0_i32_7 : i32
    %16 = arith.andi %14, %15 : i1
    %17 = arith.extui %16 : i1 to i32
    %c0_i32_8 = arith.constant 0 : i32
    %18 = arith.cmpi ne, %17, %c0_i32_8 : i32
    scf.if %18 {
      %c0 = arith.constant 0 : index
      %c0_11 = arith.constant 0 : index
      %22 = vector.load %arg8[%c0, %c0_11] : memref<16x1xf32, #tpu.memory_space<vmem>>, vector<16x1xf32>
      %cst = arith.constant 7.812500e-03 : f32
      %23 = vector.broadcast %cst : f32 to vector<16x1xf32>
      %24 = arith.mulf %22, %23 : vector<16x1xf32>
      %c0_12 = arith.constant 0 : index
      %c0_13 = arith.constant 0 : index
      %25 = vector.load %arg9[%c0_12, %c0_13] : memref<16x1xf32, #tpu.memory_space<vmem>>, vector<16x1xf32>
      %cst_14 = arith.constant 7.812500e-03 : f32
      %26 = vector.broadcast %cst_14 : f32 to vector<16x1xf32>
      %27 = arith.mulf %25, %26 : vector<16x1xf32>
      %28 = arith.mulf %24, %24 : vector<16x1xf32>
      %29 = arith.subf %27, %28 : vector<16x1xf32>
      %c0_15 = arith.constant 0 : index
      %c0_16 = arith.constant 0 : index
      %30 = vector.load %arg4[%c0_15, %c0_16] : memref<16x1xf32, #tpu.memory_space<vmem>>, vector<16x1xf32>
      %cst_17 = arith.constant 9.99999974E-6 : f32
      %31 = vector.broadcast %cst_17 : f32 to vector<16x1xf32>
      %32 = arith.addf %29, %31 : vector<16x1xf32>
      %33 = math.rsqrt %32 : vector<16x1xf32>
      %34 = arith.mulf %30, %33 : vector<16x1xf32>
      %c0_18 = arith.constant 0 : index
      %c0_19 = arith.constant 0 : index
      %35 = vector.load %arg10[%c0_18, %c0_19] : memref<16x1xf32, #tpu.memory_space<vmem>>, vector<16x1xf32>
      tpu.vector_store %arg10[%c0_18, %c0_19], %34 {strides = array<i32>} : memref<16x1xf32, #tpu.memory_space<vmem>>, vector<16x1xf32>,
      %c0_20 = arith.constant 0 : index
      %c0_21 = arith.constant 0 : index
      %36 = vector.load %arg5[%c0_20, %c0_21] : memref<16x1xf32, #tpu.memory_space<vmem>>, vector<16x1xf32>
      %37 = arith.mulf %24, %34 : vector<16x1xf32>
      %38 = arith.subf %36, %37 : vector<16x1xf32>
      %c0_22 = arith.constant 0 : index
      %c0_23 = arith.constant 0 : index
      %39 = vector.load %arg11[%c0_22, %c0_23] : memref<16x1xf32, #tpu.memory_space<vmem>>, vector<16x1xf32>
      tpu.vector_store %arg11[%c0_22, %c0_23], %38 {strides = array<i32>} : memref<16x1xf32, #tpu.memory_space<vmem>>, vector<16x1xf32>,
    } else {
    }
    %c1_i32_9 = arith.constant 1 : i32
    %19 = arith.cmpi eq, %arg0, %c1_i32_9 : i32
    %20 = arith.extui %19 : i1 to i32
    %c0_i32_10 = arith.constant 0 : i32
    %21 = arith.cmpi ne, %20, %c0_i32_10 : i32
    scf.if %21 {
      %22 = arith.index_cast %1 : i32 to index
      %c0 = arith.constant 0 : index
      %c0_11 = arith.constant 0 : index
      %23 = vector.load %arg12[%22, %c0, %c0_11] : memref<2x16x128xf32, #tpu.memory_space<vmem>>, vector<1x16x128xf32>
      %24 = vector.shape_cast %23 : vector<1x16x128xf32> to vector<16x128xf32>
      %c0_12 = arith.constant 0 : index
      %c0_13 = arith.constant 0 : index
      %25 = vector.load %arg10[%c0_12, %c0_13] : memref<16x1xf32, #tpu.memory_space<vmem>>, vector<16x1xf32>
      %26 = vector.broadcast %25 : vector<16x1xf32> to vector<16x128xf32>
      %27 = arith.mulf %24, %26 : vector<16x128xf32>
      %c0_14 = arith.constant 0 : index
      %c0_15 = arith.constant 0 : index
      %28 = vector.load %arg11[%c0_14, %c0_15] : memref<16x1xf32, #tpu.memory_space<vmem>>, vector<16x1xf32>
      %29 = vector.broadcast %28 : vector<16x1xf32> to vector<16x128xf32>
      %30 = arith.addf %27, %29 : vector<16x128xf32>
      %cst = arith.constant 0.000000e+00 : f32
      %31 = vector.broadcast %cst : f32 to vector<16x128xf32>
      %32 = arith.maximumf %30, %31 : vector<16x128xf32>
      %c0_16 = arith.constant 0 : index
      %c0_17 = arith.constant 0 : index
      %c0_18 = arith.constant 0 : index
      %33 = vector.load %arg7[%c0_16, %c0_17, %c0_18] : memref<1x16x128xf32, #tpu.memory_space<vmem>>, vector<1x16x128xf32>
      %34 = vector.shape_cast %33 : vector<1x16x128xf32> to vector<16x128xf32>
      %35 = vector.shape_cast %32 : vector<16x128xf32> to vector<1x16x128xf32>
      tpu.vector_store %arg7[%c0_16, %c0_17, %c0_18], %35 {strides = array<i32>} : memref<1x16x128xf32, #tpu.memory_space<vmem>>, vector<1x16x128xf32>,
    } else {
    }
    return
  }
  func.func @transform_0(%arg0: i32, %arg1: i32, %arg2: i32) -> (i32, i32) {
    %c0_i32 = arith.constant 0 : i32
    %c0_i32_0 = arith.constant 0 : i32
    %c0_i32_1 = arith.constant 0 : i32
    return %c0_i32, %c0_i32_0 : i32, i32
  }
  func.func @transform_1(%arg0: i32, %arg1: i32, %arg2: i32) -> (i32, i32) {
    %c0_i32 = arith.constant 0 : i32
    %c0_i32_0 = arith.constant 0 : i32
    %c0_i32_1 = arith.constant 0 : i32
    return %c0_i32, %c0_i32_0 : i32, i32
  }
  func.func @transform_2(%arg0: i32, %arg1: i32, %arg2: i32) -> (i32, i32) {
    %c0_i32 = arith.constant 0 : i32
    %c0_i32_0 = arith.constant 0 : i32
    %c0_i32_1 = arith.constant 0 : i32
    return %c0_i32, %c0_i32_0 : i32, i32
  }
  func.func @transform_3(%arg0: i32, %arg1: i32, %arg2: i32) -> (i32, i32, i32) {
    %c1_i32 = arith.constant 1 : i32
    %0 = arith.subi %c1_i32, %arg0 : i32
    %1 = arith.muli %arg1, %0 : i32
    %c1_i32_0 = arith.constant 1 : i32
    %2 = arith.subi %c1_i32_0, %arg0 : i32
    %3 = arith.muli %arg2, %2 : i32
    %c0_i32 = arith.constant 0 : i32
    %c0_i32_1 = arith.constant 0 : i32
    return %1, %c0_i32, %3 : i32, i32, i32
  }
  func.func @transform_4(%arg0: i32, %arg1: i32, %arg2: i32) -> (i32, i32, i32) {
    %0 = arith.muli %arg1, %arg0 : i32
    %1 = arith.muli %arg2, %arg0 : i32
    %c0_i32 = arith.constant 0 : i32
    %c0_i32_0 = arith.constant 0 : i32
    return %0, %c0_i32, %1 : i32, i32, i32
  }
}

</mosaic_0001>

<bundles_post_ra>
// kernel: tpu_custom_call.1
= control target key start
LH: loop header
LB: loop body
LE: loop exit
PB: predicated region body
PF: predicated region fallthrough
CT: control target
= control target key end

     0   :  { %9 = vsyncpa [#allocation8], 0  ;;  %s1043_s0 = inlined_call_operand.hbm [shape: bf16[16,32], index: 0, kind: input, shape index: {}]   ;;  %s1044_s1 = inlined_call_operand.vmem [shape: f32[16,1], index: 1, kind: input, shape index: {}]   ;;  %s1045_s2 = inlined_call_operand.vmem [shape: f32[16,1], index: 2, kind: input, shape index: {}]   ;;  %s1046_s3 = inlined_call_operand.vmem [shape: bf16[2,32,128], index: 3, kind: input, shape index: {}]   ;;  %s1047_s4 = inlined_call_operand.hbm [shape: f32[2,16,128], index: 4, kind: output, shape index: {}]  }
   0x1   :  { %10 = vsyncpa [#allocation9], 0 }
   0x2   :  { %12 = vsyncpa [#allocation9 + $0x1], 0  ;;  %s870_s15 = smov 0   ;;  %s872_s16 = smov 0  }
   0x3   :  { %s874_s17 = smov 0   ;;  %s876_s18 = smov 0  }
   0x4   :  { %s878_s19 = smov 0   ;;  %s880_s20 = smov 0  }
   0x5   :  { %s882_s21 = smov 0   ;;  %s884_s22 = smov 0  }
   0x6 LB: > { %s575_s23 = sadd.s32 4294967295, %s836_s22   ;;  %s576_s24 = sadd.s32 4294967294, %s836_s22   ;;  %s836_s22 = sphi %s884_s22, %s18_s22   ;;  %s832_s21 = sphi %s882_s21, %s1058_s21   ;;  %s828_s20 = sphi %s880_s20, %s1057_s20   ;;  %s824_s19 = sphi %s878_s19, %s1056_s19   ;;  %s820_s18 = sphi %s876_s18, %s1055_s18   ;;  %s816_s17 = sphi %s874_s17, %s1054_s17   ;;  %s812_s16 = sphi %s872_s16, %s1053_s16   ;;  %s808_s15 = sphi %s870_s15, %s1052_s15  }
   0x7   : > { %s33_s25 = sadd.s32 1, %s828_s20  ;;  %s37_s26 = sadd.s32 1, %s832_s21 }
   0x8   : > { %p35_p0 = scmp.ge.s32.totalorder %s33_s25, 2  ;;  %s138_s27 = smul.u32 %s828_s20, %s832_s21 }
   0x9   : > { %s147_s28 = sadd.s32 1, %s816_s17  ;;  %p157_p1 = scmp.ne.s32.totalorder %s816_s17, %s812_s16 }
   0xa   : > { %s1060_s25 = smov (%p35_p0, %s33_s25), 0  ;;  %s1062_s26 = smov (!%p35_p0, %s37_s26), %s832_s21 }
   0xb   : > { %p158_p2 = scmp.eq.s32.totalorder %s575_s23, 3  ;;  %p163_p3 = scmp.ne.s32.totalorder %s812_s16, %s808_s15 }
   0xc   : > { %p39_p4 = scmp.ge.s32.totalorder %s1062_s26, 2  ;;  %p164_p5 = scmp.eq.s32.totalorder %s576_s24, 3 }
   0xd   : > { %p924_p6 = por %p158_p2, %p157_p1  ;;  %p577_p7 = scmp.ge.s32.totalorder %s836_s22, 1 }
   0xe   : > { %s1064_s26 = smov (%p39_p4, %s1062_s26), 0  ;;  %p931_p8 = por %p164_p5, %p163_p3 }
   0xf   : > { %p171_p9 = scmp.lt.s32.totalorder %s836_s22, 5  ;;  %s140_s5 = smul.u32 %s1064_s26, %s1060_s25 }
  0x10   : > { %p942_p11 = scmp.eq.s32.totalorder %s575_s23, 0  ;;  %s182_s11 = sshll.u32 %s1043_s0, 4  ;;  %s183_s11 = int_to_ptr.hbm [resolvable:$true] %s182_s11 }
  0x11   : > { %p938_p10 = pnand %p577_p7, %p171_p9  ;;  %s142_s8 = ssub.s32 %s138_s27, %s140_s5 }
  0x12   : > { %p145_p12 = scmp.eq.s32.totalorder %s142_s8, 0  ;;  %s838_s13 = smov [#allocation7]  }
  0x13   : > { %p620_p13 = pneg %p938_p10  ;;  %s184_s14 = sshll.u32 %s838_s13, 4  ;;  %s185_s14 = int_to_ptr.vmem [resolvable:$true] %s184_s14 }
  0x14   : > { %s952_s12 = scalar_select %p145_p12, %s816_s17, %s147_s28  }
  0x15   : > { %p621_p0 = pnand %p942_p11, %p620_p13  ;;  %s839_s23 = smov 64  }
  0x16   : > { %s840_s24 = smov 4   ;;  %223 = sbr.rel (%p938_p10) target bundleno = 515 (0x203), region = 36 }
  0x17   : > { %623 = dma.hbm_to_vmem [thread:$0]  (!%p621_p0), %s183_s11, 128, %s185_s14, [#allocation8], %s839_s23, %s839_s23, %s840_s24  }
  0x1b   : > { %799 = dma.done.wait (%p942_p11), [#allocation8], 128  }
  0x1c   : > { %801 = vsyncadd (%p942_p11), [#allocation8], 4294967168  ;;  %s253_s27 = sand.u32 1, %s812_s16   ;;  %s256_s28 = ssub.s32 1, %s824_s19 }
  0x1d   : > { %s582_s5 = sshll.u32 %s253_s27, 4  ;;  %s257_s8 = smul.u32 %s820_s18, %s256_s28 }
  0x1e   : > { %p274_p1 = scmp.eq.s32.totalorder %s824_s19, 0  ;;  %p275_p3 = scmp.eq.s32.totalorder %s820_s18, 0 }
  0x1f   : > { %p259_p2 = scmp.lt.s32.totalorder %s257_s8, 1  ;;  %s974_s11 = scalar_lea.vmem [#allocation10], %s582_s5 }
  0x20   : > { %p276_p4 = pnand %p275_p3, %p274_p1 }
  0x21   : > { %s1066_s8 = smov (!%p259_p2, %s257_s8), 1 }
  0x22   : > { %s609_s6 = sshll.u32 %s1066_s8, 4  ;;  %282 = sbr.rel (%p276_p4) target bundleno = 44 (0x2c), region = 44 }
  0x23   : > { %s266_s10 = scalar_lea.vmem %s1046_s3, %s609_s6 }
  0x27   : > { %vm283_vm0 = vcmask 7168   ;;  %v841_v0 = vmov 0.0  }
  0x28   : > { %284 = vst.msk [vmem:[#allocation2] sm:$0xff] %vm283_vm0, %v841_v0 }
  0x29   : > { %285 = vst.msk [vmem:[#allocation2 + $0x8] sm:$0xff] %vm283_vm0, %v841_v0 }
  0x2a   : > { %286 = vst.msk [vmem:[#allocation3] sm:$0xff] %vm283_vm0, %v841_v0 }
  0x2b   : > { %287 = vst.msk [vmem:[#allocation3 + $0x8] sm:$0xff] %vm283_vm0, %v841_v0 }
  0x2c PF: > { %p586_p5 = scmp.ne.s32.totalorder %s824_s19, 0 }
  0x2d   : > { %s600_s13 = sshll.u32 (!%p586_p5), %s820_s18, 4 }
  0x2e   : > { %290 = sbr.rel (%p586_p5) target bundleno = 314 (0x13a), region = 48  ;;  %s333_s14 = scalar_lea.vmem (!%p586_p5), [#allocation6], %s600_s13 }
  0x33   : > { %v612_v1 = vld [vmem:[%s266_s10 + $0x8] sm:$0xff]  ;;  %v611_v2 = vld [vmem:[%s266_s10] sm:$0xff]  ;;  %vm314_vm1 = vcmask 261120   ;;  %vm344_vm2 = vcmask 7168   ;;  %v347_v10 = vld [vmem:[#allocation3] sm:$0xff] }
  0x34   : > { %324 = vmatpush.bf16.msra.mxu0 %v612_v1  ;;  %v610_v3 = vld [vmem:[#allocation7] sm:$0xff]  ;;  %v337_v14 = vld [vmem:[#allocation2 + $0x8] sm:$0xff]  ;;  %v348_v16 = vld [vmem:[#allocation3 + $0x8] sm:$0xff] }
  0x35   : > { %v336_v8 = vld [vmem:[#allocation2] sm:$0xff] }
  0x38   : > { %325 = vmatpush.bf16.msra.mxu0 %v611_v2 }
  0x3b   : > { %599 = vmatmul.msk.bf16.vlgmr.msra.gmra.mxu0 %vm314_vm1, %v610_v3 }
  0xb8   : > { %v327_v4 = vpop.f32.mrf.mxu0 }
  0xb9   : > { %338 = vadd.xlane.f32.xlu0 %v327_v4  ;;  %v349_v5 = vmul.f32 %v327_v4, %v327_v4  ;;  %334 = vst [vmem:[%s333_s14] sm:$0xff] %v327_v4 }
  0xbb   : > { %351 = vadd.xlane.f32.xlu1 %v349_v5 }
  0xc0   : > { %v329_v6 = vpop.f32.mrf.mxu0 }
  0xc1   : > { %335 = vst [vmem:[%s333_s14 + $0x8] sm:$0xff] %v329_v6  ;;  %340 = vadd.xlane.f32.xlu0 %v329_v6  ;;  %v350_v7 = vmul.f32 %v329_v6, %v329_v6 }
  0xc3   : > { %353 = vadd.xlane.f32.xlu1 %v350_v7 }
 0x12c   : > { %v339_v9 = vpop.xlane.xlu0 %338 }
 0x12d   : > { %v342_v11 = vadd.f32 %v339_v9, %v336_v8 }
 0x12e   : > { %v352_v12 = vpop.xlane.xlu1 %351 }
 0x12f   : > { %345 = vst.msk [vmem:[#allocation2] sm:$0xff] %vm344_vm2, %v342_v11  ;;  %v355_v13 = vadd.f32 %v352_v12, %v347_v10 }
 0x131   : > { %357 = vst.msk [vmem:[#allocation3] sm:$0xff] %vm344_vm2, %v355_v13 }
 0x134   : > { %v341_v15 = vpop.xlane.xlu0 %340 }
 0x135   : > { %v343_v17 = vadd.f32 %v341_v15, %v337_v14 }
 0x136   : > { %v354_v18 = vpop.xlane.xlu1 %353 }
 0x137   : > { %346 = vst.msk [vmem:[#allocation2 + $0x8] sm:$0xff] %vm344_vm2, %v343_v17  ;;  %v356_v19 = vadd.f32 %v354_v18, %v348_v16 }
 0x139   : > { %358 = vst.msk [vmem:[#allocation3 + $0x8] sm:$0xff] %vm344_vm2, %v356_v19 }
 0x13a PF: > { %p359_p7 = scmp.eq.s32.totalorder %s824_s19, 1 }
 0x13c   : > { %p360_p9 = pnand %p359_p7, %p275_p3 }
 0x13e   : > { %365 = sbr.rel (%p360_p9) target bundleno = 358 (0x166), region = 52 }
 0x143   : > { %v366_v20 = vld [vmem:[#allocation2] sm:$0xff]  ;;  %v370_v21 = vld [vmem:[#allocation3] sm:$0xff]  ;;  %v367_v24 = vld [vmem:[#allocation2 + $0x8] sm:$0xff]  ;;  %vm404_vm9 = vcmask 7168  }
 0x144   : > { %v368_v22 = vmul.f32 0.0078125, %v366_v20  ;;  %v372_v23 = vmul.f32 0.0078125, %v370_v21  ;;  %v371_v25 = vld [vmem:[#allocation3 + $0x8] sm:$0xff]  ;;  %v369_v26 = vmul.f32 0.0078125, %v367_v24  ;;  %v378_v44 = vld [vmem:[%s1044_s1] sm:$0xff]  ;;  %v379_v46 = vld [vmem:[%s1044_s1 + $0x8] sm:$0xff] }
 0x145   : > { %v373_v27 = vmul.f32 0.0078125, %v371_v25  ;;  %v407_v52 = vld [vmem:[%s1045_s2] sm:$0xff]  ;;  %v408_v54 = vld [vmem:[%s1045_s2 + $0x8] sm:$0xff] }
 0x146   : > { %v374_v28 = vmul.f32 %v368_v22, %v368_v22  ;;  %v375_v29 = vmul.f32 %v369_v26, %v369_v26 }
 0x148   : > { %v376_v30 = vsub.f32 %v372_v23, %v374_v28  ;;  %v377_v31 = vsub.f32 %v373_v27, %v375_v29 }
 0x14a   : > { %v380_v32 = vadd.f32 1e-05, %v376_v30  ;;  %v381_v33 = vadd.f32 1e-05, %v377_v31 }
 0x14c   : > { %702 = vrsqrt.f32 %v380_v32  ;;  %vm388_vm3 = vweird.f32 %v380_v32  ;;  %vm398_vm5 = vweird.f32 %v381_v33 }
 0x14d   : > { %704 = vrsqrt.f32 %v381_v33 }
 0x152   : > { %v703_v34 = vpop.eup %702 }
 0x153   : > { %v705_v35 = vpop.eup %704  ;;  %v383_v36 = vmul.f32 %v703_v34, %v380_v32  ;;  %vm389_vm4 = vweird.f32 %v703_v34 }
 0x154   : > { %v393_v37 = vmul.f32 %v705_v35, %v381_v33  ;;  %vm399_vm6 = vweird.f32 %v705_v35  ;;  %vm390_vm7 = vmor %vm388_vm3, %vm389_vm4 }
 0x155   : > { %v384_v38 = vmul.f32 %v703_v34, %v383_v36  ;;  %vm400_vm8 = vmor %vm398_vm5, %vm399_vm6 }
 0x156   : > { %v394_v39 = vmul.f32 %v705_v35, %v393_v37 }
 0x157   : > { %v385_v40 = vmul.f32 0.5, %v384_v38 }
 0x158   : > { %v395_v41 = vmul.f32 0.5, %v394_v39 }
 0x159   : > { %v386_v42 = vsub.f32 1.5, %v385_v40 }
 0x15a   : > { %v396_v43 = vsub.f32 1.5, %v395_v41 }
 0x15b   : > { %v387_v45 = vmul.f32 %v703_v34, %v386_v42 }
 0x15c   : > { %v397_v47 = vmul.f32 %v705_v35, %v396_v43 }
 0x15d   : > { %v391_v48 = vsel %vm390_vm7, %v703_v34, %v387_v45 }
 0x15e   : > { %v402_v49 = vmul.f32 %v391_v48, %v378_v44  ;;  %v401_v50 = vsel %vm400_vm8, %v705_v35, %v397_v47 }
 0x15f   : > { %v403_v51 = vmul.f32 %v401_v50, %v379_v46 }
 0x160   : > { %405 = vst.msk [vmem:[#allocation4] sm:$0xff] %vm404_vm9, %v402_v49  ;;  %v409_v53 = vmul.f32 %v402_v49, %v368_v22 }
 0x161   : > { %406 = vst.msk [vmem:[#allocation4 + $0x8] sm:$0xff] %vm404_vm9, %v403_v51  ;;  %v410_v55 = vmul.f32 %v403_v51, %v369_v26 }
 0x162   : > { %v411_v56 = vsub.f32 %v407_v52, %v409_v53 }
 0x163   : > { %v412_v57 = vsub.f32 %v408_v54, %v410_v55 }
 0x164   : > { %413 = vst.msk [vmem:[#allocation5] sm:$0xff] %vm404_vm9, %v411_v56 }
 0x165   : > { %414 = vst.msk [vmem:[#allocation5 + $0x8] sm:$0xff] %vm404_vm9, %v412_v57 }
 0x166 PF: > { %p602_p10 = scmp.ne.s32.totalorder %s824_s19, 1 }
 0x167   : > { %s603_s10 = sshll.u32 (!%p602_p10), %s820_s18, 4 }
 0x168   : > { %417 = sbr.rel (%p602_p10) target bundleno = 497 (0x1f1), region = 56  ;;  %s419_s13 = scalar_lea.vmem (!%p602_p10), [#allocation6], %s603_s10 }
 0x16d   : > { %v436_v58 = vld [vmem:[#allocation5] sm:$0xff]  ;;  %v422_v59 = vld [vmem:[#allocation4] sm:$0xff]  ;;  %v842_v60 = vmov 0   ;;  %v437_v61 = vld [vmem:[#allocation5 + $0x8] sm:$0xff] }
 0x16e   : > { %707 = vset.pattern.permute.xlu1 %v842_v60  ;;  %706 = vset.pattern.permute.xlu0 %v842_v60  ;;  %v423_v62 = vld [vmem:[#allocation4 + $0x8] sm:$0xff]  ;;  %v420_v63 = vld [vmem:[%s419_s13] sm:$0xff] }
 0x16f   : > { %440 = vperm.xlu1 %707, %v436_v58   ;;  %426 = vperm.xlu0 %706, %v422_v59   ;;  %v421_v5 = vld [vmem:[%s419_s13 + $0x8] sm:$0xff] }
 0x177   : > { %445 = vperm.xlu1 %707, %v437_v61   ;;  %431 = vperm.xlu0 %706, %v423_v62  }
 0x1e1   : > { %v441_v0 = vpop.permute.xlu1 %440  ;;  %v427_v1 = vpop.permute.xlu0 %426 }
 0x1e2   : > { %v434_v2 = vmul.f32 %v427_v1, %v420_v63 }
 0x1e4   : > { %v448_v3 = vadd.f32 %v441_v0, %v434_v2 }
 0x1e6   : > { %v450_v4 = vmax.f32 %v448_v3, 0.0 }
 0x1e8   : > { %452 = vst [vmem:[%s974_s11] sm:$0xff] %v450_v4 }
 0x1e9   : > { %v432_v6 = vpop.permute.xlu0 %431  ;;  %v446_v8 = vpop.permute.xlu1 %445 }
 0x1ea   : > { %v435_v7 = vmul.f32 %v432_v6, %v421_v5 }
 0x1ec   : > { %v449_v9 = vadd.f32 %v446_v8, %v435_v7 }
 0x1ee   : > { %v451_v10 = vmax.f32 %v449_v9, 0.0 }
 0x1f0   : > { %453 = vst [vmem:[%s974_s11 + $0x8] sm:$0xff] %v451_v10 }
 0x1f1 PF: > { %s462_s14 = smul.u32 %s820_s18, %s824_s19  ;;  %s470_s23 = sshll.u32 %s974_s11, 4  ;;  %s471_s23 = int_to_ptr.vmem [resolvable:$true] %s470_s23 }
 0x1f2   : > { %s455_s7 = scalar_lea.sflag [#allocation9], %s253_s27  ;;  %s758_s19 = scalar_lea.hbm %s1047_s4, 32 }
 0x1f3   : > { %s613_s24 = sshll.u32 %s462_s14, 4 }
 0x1f4   : > { %s469_s8 = scalar_lea.hbm %s1047_s4, %s613_s24 }
 0x1f5   : > { %s472_s6 = sshll.u32 %s469_s8, 4  ;;  %s473_s6 = int_to_ptr.hbm [resolvable:$true] %s472_s6 }
 0x1f6   : > { %s752_s9 = sshra.s32 %s473_s6, 4  ;;  %s753_s9 = int_to_ptr.hbm [resolvable:$true] %s752_s9 }
 0x1f7   : > { %s754_s10 = scalar_lea.hbm %s753_s9, 16  ;;  %p759_p0 = scmp.lt.s32.totalorder %s753_s9, %s1047_s4 }
 0x1f8   : > { %p755_p11 = scmp.ne.s32.totalorder %s753_s9, %s754_s10  ;;  %p760_p1 = scmp.lt.s32.totalorder %s758_s19, %s754_s10 }
 0x1fa   : > { %p756_p12 = pnand %p755_p11, %p924_p6  ;;  %p761_p2 = por %p760_p1, %p759_p0 }
 0x1fc   : > { %p757_p13 = pneg %p756_p12 }
 0x1fe   : > { %p762_p3 = pnand %p761_p2, %p757_p13 }
 0x200   : > { %765 = shalt.err (!%p762_p3)
}
 0x201   : > { %s843_s27 = smov 128   ;;  %s844_s24 = smov 8  }
 0x202   : > { %618 = dma.vmem_to_hbm [thread:$0]  (%p924_p6), %s471_s23, 256, %s473_s6, %s455_s7, %s843_s27, %s843_s27, %s844_s24  }
 0x203 PF: > { %p630_p4 = scmp.ge.s32.totalorder %s836_s22, 2  ;;  %s487_s28 = sand.u32 1, %s808_s15  }
 0x204   : > { %s488_s5 = scalar_lea.sflag [#allocation9], %s487_s28 }
 0x205   : > { %p625_p5 = pnand %p630_p4, %p931_p8 }
 0x207   : > { %p626_p7 = pneg %p625_p5 }
 0x209   : > { %803 = dma.done.wait (%p626_p7), %s488_s5, 256  }
 0x20a   : > { %805 = vsyncadd (%p626_p7), %s488_s5, 4294967040  ;;  %s18_s22 = sadd.s32 1, %s836_s22   ;;  %s1052_s15 = smov %s812_s16 }
 0x20b   : > { %p15_p9 = scmp.ge.s32.totalorder %s18_s22, 6   ;;  %s1053_s16 = smov %s816_s17 }
 0x20c   : > { %s1054_s17 = smov %s952_s12  ;;  %s1055_s18 = smov %s828_s20 }
 0x20d   : > { %s1056_s19 = smov %s832_s21  ;;  %s1057_s20 = smov %s1060_s25 }
 0x20e   : > { %s1058_s21 = smov %s1064_s26  ;;  %17 = sbr.rel (!%p15_p9) target bundleno = 6 (0x6), region = 94 }
 0x213   :  { %494 = vsyncpa [#allocation8], 1 }
 0x214   :  { %496 = vsyncpa [#allocation8 + $0x1], 1 }
 0x215   :  { %497 = vsyncpa [#allocation9], 1 }
 0x216   :  { %499 = vsyncpa [#allocation9 + $0x1], 1 }

</bundles_post_ra>
